<compile_context>
chip_gen: v7x
topology: tpu7x:2x2x1
jax: 0.10.0
libtpu: 0.0.40
codegen_flags: <defaults>
</compile_context>

<pallas_src>
import math

import numpy as np

import jax
import jax.numpy as jnp
from jax.experimental import pallas as pl
from jax.experimental.pallas import tpu as pltpu


# ---------------------------------------------------------------------------
# Small helpers
# ---------------------------------------------------------------------------
def _round_up(a, b):
    return ((a + b - 1) // b) * b


def _choose_tiles(K, N, W_b, tk_target):
    """MXU-friendly tile sizes.

    tk: must be a multiple of 128 (it is the lane dim of the x block).  Prefer
        a tile that also covers whole BEV rows (multiple of W_b): then each
        bilinear sample touches at most two K blocks.
    tn: lane-dense output tile (512/256/128), preferring an exact divisor of N.
    """
    row_aligned = (128 * W_b) // math.gcd(128, W_b)  # lcm(128, W_b)
    if row_aligned <= max(512, tk_target):
        tk = row_aligned * max(1, tk_target // row_aligned)
    else:
        tk = tk_target                       # give up on whole-row alignment
    Kp = _round_up(K, tk)

    tn = None
    for c in (512, 256, 128):
        if N % c == 0:
            tn = c
            break
    if tn is None:
        tn = 256 if N > 256 else 128
    Np = _round_up(N, tn)
    return tk, tn, Kp, Np


# ---------------------------------------------------------------------------
# Host-side geometry (mirrors BEV2RV.__init__)
# ---------------------------------------------------------------------------
def make_sample_coords(bev_size, rv_size, sensor_h=1.73, max_range=50.0,
                       fov_phi=(-math.pi, math.pi),
                       fov_theta=(-25 * math.pi / 180, 3 * math.pi / 180),
                       range_xy=(-50.0, 50.0, -50.0, 50.0)):
    """Float pixel coords into the BEV map for every RV pixel, flattened (N,)."""
    H_b, W_b = bev_size
    H_r, W_r = rv_size
    xmin, xmax, ymin, ymax = range_xy

    theta = np.tile(np.linspace(fov_theta[1], fov_theta[0], H_r).reshape(-1, 1),
                    (1, W_r))
    phi = np.tile(np.linspace(fov_phi[0], fov_phi[1], W_r).reshape(1, -1),
                  (H_r, 1))
    sin_theta = np.clip(np.sin(theta), -1.0, -0.017)
    r = np.minimum(sensor_h / -sin_theta, max_range)
    x = r * np.cos(theta) * np.cos(phi)
    y = r * np.cos(theta) * np.sin(phi)
    x_pix = (x - xmin) / (xmax - xmin) * (W_b - 1)
    y_pix = (ymax - y) / (ymax - ymin) * (H_b - 1)
    # grid normalisation to [-1,1] followed by grid_sample's align_corners=True
    # un-normalisation cancels exactly, so (x_pix, y_pix) ARE the sample coords.
    return (x_pix.reshape(-1).astype(np.float32),
            y_pix.reshape(-1).astype(np.float32))


# ---------------------------------------------------------------------------
# Block-compressed sampling operator + CSR step metadata.
# ---------------------------------------------------------------------------
def build_csr_operator(bev_size, rv_size, ix, iy, tk, tn, Kp, Np):
    """Returns:
         s_blocks : (n_steps, tk, tn) f32 -- only the visited S blocks, in
                    CSR step order (grouped by N tile, K block ascending).
         kb, nb   : (n_steps,) i32 -- K-block / N-tile index per step.
         first, last : (n_steps,) i32 -- first / last step of its N tile.
         pos      : (N,) i64 -- permuted column position of each RV pixel.
    """
    H_b, W_b = bev_size
    H_r, W_r = rv_size
    N = H_r * W_r
    n_n = Np // tn
    n_kb = Kp // tk

    x0 = np.floor(ix)
    y0 = np.floor(iy)
    x1 = x0 + 1.0
    y1 = y0 + 1.0
    wx1 = ix - x0
    wx0 = 1.0 - wx1
    wy1 = iy - y0
    wy0 = 1.0 - wy1

    # Column permutation: group RV pixels by the BEV row they sample, so each
    # N tile touches as few K blocks as possible (contiguous RV pixels sweep a
    # ring in BEV and would otherwise touch many row-blocks).
    perm = np.lexsort((x0.astype(np.int64), y0.astype(np.int64)))  # primary: y0
    pos = np.empty(N, np.int64)
    pos[perm] = np.arange(N)                 # pixel n lives in column pos[n]

    rows_l, cols_l, wts_l = [], [], []
    for xs, ys, w in ((x0, y0, wx0 * wy0), (x1, y0, wx1 * wy0),
                      (x0, y1, wx0 * wy1), (x1, y1, wx1 * wy1)):
        xi = xs.astype(np.int64)
        yi = ys.astype(np.int64)
        keep = (xi >= 0) & (xi < W_b) & (yi >= 0) & (yi < H_b) & (w > 0)
        rows_l.append((yi * W_b + xi)[keep])
        cols_l.append(pos[keep])
        wts_l.append(w[keep].astype(np.float32))
    rows = np.concatenate(rows_l)
    cols = np.concatenate(cols_l)
    wts = np.concatenate(wts_l)

    kb_e = rows // tk
    nb_e = cols // tn
    key = nb_e * n_kb + kb_e
    uniq, inv = np.unique(key, return_inverse=True)     # sorted by (nb, kb)
    step_nb = (uniq // n_kb).astype(np.int64)
    step_kb = (uniq % n_kb).astype(np.int64)
    s_blocks = np.zeros((uniq.size, tk, tn), np.float32)
    np.add.at(s_blocks, (inv.reshape(-1), rows % tk, cols % tn), wts)

    # N tiles with no contributing BEV pixel still need one (zero) step so the
    # kernel writes their (all-zero) output block.
    missing = np.setdiff1d(np.arange(n_n), step_nb)
    if missing.size:
        step_nb = np.concatenate([step_nb, missing])
        step_kb = np.concatenate([step_kb, np.zeros(missing.size, np.int64)])
        s_blocks = np.concatenate(
            [s_blocks, np.zeros((missing.size, tk, tn), np.float32)], axis=0)
        order = np.argsort(step_nb * n_kb + step_kb, kind="stable")
        step_nb, step_kb, s_blocks = step_nb[order], step_kb[order], s_blocks[order]

    n_steps = step_nb.size
    first = np.zeros(n_steps, np.int32)
    last = np.zeros(n_steps, np.int32)
    first[0] = 1
    last[-1] = 1
    if n_steps > 1:
        change = step_nb[1:] != step_nb[:-1]
        first[1:] = change
        last[:-1] = change

    return (s_blocks, step_kb.astype(np.int32), step_nb.astype(np.int32),
            first, last, pos)


# ---------------------------------------------------------------------------
# Pallas kernel: CSR-flattened block-sparse reduction.
#   step s contributes  x[m_tile, kb[s]] @ S_blocks[s]  to  out[m_tile, nb[s]].
# ---------------------------------------------------------------------------
def _bev2rv_kernel(kb_ref, nb_ref, first_ref, last_ref, x_ref, s_ref, o_ref,
                   acc_ref):
    s = pl.program_id(1)

    @pl.when(first_ref[s] == 1)
    def _init():
        acc_ref[...] = jnp.zeros_like(acc_ref)

    # Every grid step does real MXU work (no padded/skipped iterations).
    acc_ref[...] += jnp.dot(x_ref[...], s_ref[...],
                            preferred_element_type=jnp.float32)

    @pl.when(last_ref[s] == 1)
    def _finalize():
        o_ref[...] = acc_ref[...].astype(o_ref.dtype)


class BEV2RVPallas:
    """Forward-equivalent of the PyTorch BEV2RV module (fixed-grid grid_sample)."""

    def __init__(self, bev_size, rv_size, **geom_kwargs):
        self.bev_size = tuple(bev_size)
        self.rv_size = tuple(rv_size)
        H_b, W_b = self.bev_size
        H_r, W_r = self.rv_size
        self.K = H_b * W_b
        self.N = H_r * W_r

        # Generation-native contraction tile (128 on v5e, 256 on v6e/v7x).
        try:
            kind = jax.devices()[0].device_kind.lower()
        except Exception:
            kind = ""
        tk_target = 128 if "v5" in kind else 256

        self.tk, self.tn, self.Kp, self.Np = _choose_tiles(
            self.K, self.N, W_b, tk_target)

        self.ix, self.iy = make_sample_coords(self.bev_size, self.rv_size,
                                              **geom_kwargs)
        (s_blocks, kb, nb, first, last, pos) = build_csr_operator(
            self.bev_size, self.rv_size, self.ix, self.iy,
            self.tk, self.tn, self.Kp, self.Np)

        # bf16 MXU operands; f32 accumulation in the kernel scratch.
        # TODO(synk): offer an f32-operand path if exact f32 grid_sample parity
        # (beyond ~1e-2 relative) is required.
        self.s_blocks = jnp.asarray(s_blocks, dtype=jnp.bfloat16)
        self.kb = jnp.asarray(kb)
        self.nb = jnp.asarray(nb)
        self.first = jnp.asarray(first)
        self.last = jnp.asarray(last)
        self.n_steps = int(kb.shape[0])
        self.col_of_pixel = jnp.asarray(pos.astype(np.int32))
        self.identity_perm = bool(np.array_equal(pos, np.arange(self.N)))

    def __call__(self, bev_feat):
        B, C, H_b, W_b = bev_feat.shape
        assert (H_b, W_b) == self.bev_size
        H_r, W_r = self.rv_size
        K, N, Kp, Np = self.K, self.N, self.Kp, self.Np
        tk, tn, n_steps = self.tk, self.tn, self.n_steps
        out_dtype = bev_feat.dtype

        M = B * C
        # Single M tile whenever it fits comfortably in VMEM: then every x and
        # S block is streamed exactly once.  tm multiple of 16 for bf16 packing.
        Mp = _round_up(M, 16)
        if Mp <= 512:
            tm = Mp
        else:
            # NOTE: with n_m > 1 the M axis stays "parallel" so the v7x
            # megacore can shard it across its 2 TensorCores.
            tm = 256
            Mp = _round_up(M, tm)
        n_m = Mp // tm

        x = bev_feat.reshape(M, K).astype(jnp.bfloat16)
        if Mp != M or Kp != K:
            x = jnp.pad(x, ((0, Mp - M), (0, Kp - K)))

        x_map = lambda i, s, kb, nb, first, last: (i, kb[s])
        s_map = lambda i, s, kb, nb, first, last: (s, 0, 0)
        o_map = lambda i, s, kb, nb, first, last: (i, nb[s])

        # Consistent advisory cost: only the visited blocks are counted.
        flops = 2 * tm * tk * tn * n_steps * n_m
        bytes_accessed = int(n_m * n_steps * (tm * tk + tk * tn) * 2
                             + Mp * Np * np.dtype(out_dtype).itemsize)

        out = pl.pallas_call(
            _bev2rv_kernel,
            out_shape=jax.ShapeDtypeStruct((Mp, Np), out_dtype),
            grid_spec=pltpu.PrefetchScalarGridSpec(
                num_scalar_prefetch=4,
                grid=(n_m, n_steps),
                in_specs=[
                    pl.BlockSpec((tm, tk), x_map),        # x tile (rows = B*C)
                    pl.BlockSpec((None, tk, tn), s_map),  # visited S block (CSR)
                ],
                out_specs=pl.BlockSpec((tm, tn), o_map),
                scratch_shapes=[pltpu.VMEM((tm, tn), jnp.float32)],
            ),
            compiler_params=pltpu.CompilerParams(
                dimension_semantics=("parallel", "arbitrary")),
            cost_estimate=pl.CostEstimate(
                flops=flops, transcendentals=0, bytes_accessed=bytes_accessed),
        )(self.kb, self.nb, self.first, self.last, x, self.s_blocks)

        out = out[:M]
        if not (self.identity_perm and Np == N):
            # Undo the construction-time RV-pixel permutation (also drops the
            # N padding) in a single gather pass.
            out = out[:, self.col_of_pixel]
        return out.reshape(B, C, H_r, W_r)


# ---------------------------------------------------------------------------
# Pure-JAX f32 reference (gather form of grid_sample) for a sanity check.
# ---------------------------------------------------------------------------
def grid_sample_ref(bev, ix, iy, rv_size):
    B, C, H_b, W_b = bev.shape
    H_r, W_r = rv_size
    x0 = np.floor(ix)
    y0 = np.floor(iy)
    x1 = x0 + 1.0
    y1 = y0 + 1.0
    wx1 = ix - x0
    wx0 = 1.0 - wx1
    wy1 = iy - y0
    wy0 = 1.0 - wy1
    out = jnp.zeros((B, C, H_r * W_r), jnp.float32)
    corners = ((x0, y0, wx0 * wy0), (x1, y0, wx1 * wy0),
               (x0, y1, wx0 * wy1), (x1, y1, wx1 * wy1))
    bev_f32 = bev.astype(jnp.float32)
    for xs, ys, w in corners:
        xi = xs.astype(np.int64)
        yi = ys.astype(np.int64)
        valid = (xi >= 0) & (xi < W_b) & (yi >= 0) & (yi < H_b)
        xc = np.clip(xi, 0, W_b - 1)
        yc = np.clip(yi, 0, H_b - 1)
        v = bev_f32[:, :, yc, xc]                                  # (B, C, N)
        out = out + jnp.asarray(np.where(valid, w, 0.0),
                                jnp.float32)[None, None, :] * v
    return out.reshape(B, C, H_r, W_r)


if __name__ == "__main__":
    # Small shapes consistent with the module's forward.
    B, C = 2, 4
    bev_size = (16, 16)   # (H_b, W_b)
    rv_size = (8, 16)     # (H_r, W_r)

    key = jax.random.PRNGKey(0)
    bev_feat = jax.random.normal(key, (B, C, bev_size[0], bev_size[1]),
                                 dtype=jnp.float32)

    module = BEV2RVPallas(bev_size, rv_size)
    out = jax.block_until_ready(module(bev_feat))

    # Correctness check (bf16 operands in the kernel -> relaxed tolerance).
    ref = grid_sample_ref(bev_feat, module.ix, module.iy, rv_size)
    assert out.shape == (B, C, rv_size[0], rv_size[1])
    assert out.dtype == bev_feat.dtype
    assert jnp.allclose(out.astype(jnp.float32), ref, atol=5e-2, rtol=5e-2)

    print("KERNEL_OK")
</pallas_src>

<mosaic_0001>
module attributes {stable_mosaic.version = 11 : i64} {
  func.func @_bev2rv_kernel(%arg0: i32, %arg1: i32, %arg2: memref<1xi32, #tpu.memory_space<smem>>, %arg3: memref<1xi32, #tpu.memory_space<smem>>, %arg4: memref<1xi32, #tpu.memory_space<smem>>, %arg5: memref<1xi32, #tpu.memory_space<smem>>, %arg6: memref<16x256xbf16, #tpu.memory_space<vmem>>, %arg7: memref<1x256x128xbf16, #tpu.memory_space<vmem>>, %arg8: memref<16x128xf32, #tpu.memory_space<vmem>>, %arg9: memref<16x128xf32, #tpu.memory_space<vmem>>) attributes {dimension_semantics = [#tpu.dimension_semantics<parallel>, #tpu.dimension_semantics<arbitrary>], iteration_bounds = array<i64: 1, 1>, scalar_prefetch = 4 : i64, scratch_operands = 1 : i64, tpu.core_type = #tpu.core_type<tc>, window_params = [{transform_indices = @transform_0, window_bounds = array<i64: 16, 256>}, {transform_indices = @transform_1, window_bounds = array<i64: 1, 256, 128>}, {transform_indices = @transform_2, window_bounds = array<i64: 16, 128>}]} {
    %0 = arith.index_cast %arg1 : i32 to index
    %1 = memref.load %arg4[%0] : memref<1xi32, #tpu.memory_space<smem>>
    %c1_i32 = arith.constant 1 : i32
    %2 = arith.cmpi eq, %1, %c1_i32 : i32
    %3 = arith.extui %2 : i1 to i32
    %c0_i32 = arith.constant 0 : i32
    %4 = arith.cmpi ne, %3, %c0_i32 : i32
    scf.if %4 {
      %cst_10 = arith.constant 0.000000e+00 : f32
      %17 = vector.broadcast %cst_10 : f32 to vector<16x128xf32>
      %c0_11 = arith.constant 0 : index
      %c0_12 = arith.constant 0 : index
      %18 = vector.load %arg9[%c0_11, %c0_12] : memref<16x128xf32, #tpu.memory_space<vmem>>, vector<16x128xf32>
      tpu.vector_store %arg9[%c0_11, %c0_12], %17 {strides = array<i32>} : memref<16x128xf32, #tpu.memory_space<vmem>>, vector<16x128xf32>,
    } else {
    }
    %c0 = arith.constant 0 : index
    %c0_0 = arith.constant 0 : index
    %5 = vector.load %arg9[%c0, %c0_0] : memref<16x128xf32, #tpu.memory_space<vmem>>, vector<16x128xf32>
    %c0_1 = arith.constant 0 : index
    %c0_2 = arith.constant 0 : index
    %6 = vector.load %arg6[%c0_1, %c0_2] : memref<16x256xbf16, #tpu.memory_space<vmem>>, vector<16x256xbf16>
    %c0_3 = arith.constant 0 : index
    %c0_4 = arith.constant 0 : index
    %c0_5 = arith.constant 0 : index
    %7 = vector.load %arg7[%c0_3, %c0_4, %c0_5] : memref<1x256x128xbf16, #tpu.memory_space<vmem>>, vector<1x256x128xbf16>
    %8 = vector.shape_cast %7 : vector<1x256x128xbf16> to vector<256x128xbf16>
    %cst = arith.constant dense<0.000000e+00> : vector<16x128xf32>
    %9 = tpu.matmul %6, %8, %cst {dimension_numbers = #tpu.dot_dimension_numbers<[1], [0], [0], [1], [0, 0, 1, 1], [], []>} : vector<16x256xbf16>, vector<256x128xbf16>, vector<16x128xf32> -> vector<16x128xf32>
    %10 = arith.addf %5, %9 : vector<16x128xf32>
    %c0_6 = arith.constant 0 : index
    %c0_7 = arith.constant 0 : index
    %11 = vector.load %arg9[%c0_6, %c0_7] : memref<16x128xf32, #tpu.memory_space<vmem>>, vector<16x128xf32>
    tpu.vector_store %arg9[%c0_6, %c0_7], %10 {strides = array<i32>} : memref<16x128xf32, #tpu.memory_space<vmem>>, vector<16x128xf32>,
    %12 = arith.index_cast %arg1 : i32 to index
    %13 = memref.load %arg5[%12] : memref<1xi32, #tpu.memory_space<smem>>
    %c1_i32_8 = arith.constant 1 : i32
    %14 = arith.cmpi eq, %13, %c1_i32_8 : i32
    %15 = arith.extui %14 : i1 to i32
    %c0_i32_9 = arith.constant 0 : i32
    %16 = arith.cmpi ne, %15, %c0_i32_9 : i32
    scf.if %16 {
      %c0_10 = arith.constant 0 : index
      %c0_11 = arith.constant 0 : index
      %17 = vector.load %arg9[%c0_10, %c0_11] : memref<16x128xf32, #tpu.memory_space<vmem>>, vector<16x128xf32>
      %c0_12 = arith.constant 0 : index
      %c0_13 = arith.constant 0 : index
      %18 = vector.load %arg8[%c0_12, %c0_13] : memref<16x128xf32, #tpu.memory_space<vmem>>, vector<16x128xf32>
      tpu.vector_store %arg8[%c0_12, %c0_13], %17 {strides = array<i32>} : memref<16x128xf32, #tpu.memory_space<vmem>>, vector<16x128xf32>,
    } else {
    }
    return
  }
  func.func @transform_0(%arg0: i32, %arg1: i32, %arg2: memref<1xi32, #tpu.memory_space<smem>>, %arg3: memref<1xi32, #tpu.memory_space<smem>>, %arg4: memref<1xi32, #tpu.memory_space<smem>>, %arg5: memref<1xi32, #tpu.memory_space<smem>>) -> (i32, i32) {
    %0 = arith.index_cast %arg1 : i32 to index
    %1 = memref.load %arg2[%0] : memref<1xi32, #tpu.memory_space<smem>>
    %c0_i32 = arith.constant 0 : i32
    return %arg0, %1 : i32, i32
  }
  func.func @transform_1(%arg0: i32, %arg1: i32, %arg2: memref<1xi32, #tpu.memory_space<smem>>, %arg3: memref<1xi32, #tpu.memory_space<smem>>, %arg4: memref<1xi32, #tpu.memory_space<smem>>, %arg5: memref<1xi32, #tpu.memory_space<smem>>) -> (i32, i32, i32) {
    %c0_i32 = arith.constant 0 : i32
    %c0_i32_0 = arith.constant 0 : i32
    %c0_i32_1 = arith.constant 0 : i32
    return %arg1, %c0_i32, %c0_i32_0 : i32, i32, i32
  }
  func.func @transform_2(%arg0: i32, %arg1: i32, %arg2: memref<1xi32, #tpu.memory_space<smem>>, %arg3: memref<1xi32, #tpu.memory_space<smem>>, %arg4: memref<1xi32, #tpu.memory_space<smem>>, %arg5: memref<1xi32, #tpu.memory_space<smem>>) -> (i32, i32) {
    %0 = arith.index_cast %arg1 : i32 to index
    %1 = memref.load %arg3[%0] : memref<1xi32, #tpu.memory_space<smem>>
    %c0_i32 = arith.constant 0 : i32
    return %arg0, %1 : i32, i32
  }
}

</mosaic_0001>

<bundles_post_ra>
// kernel: tpu_custom_call.1
= control target key start
LH: loop header
LB: loop body
LE: loop exit
PB: predicated region body
PF: predicated region fallthrough
CT: control target
= control target key end

     0   :  { %s524_s0 = inlined_call_operand.<no memory space> [shape: s32[1], index: 0, kind: input, shape index: {}]   ;;  %s525_s1 = inlined_call_operand.<no memory space> [shape: s32[1], index: 1, kind: input, shape index: {}]   ;;  %s526_s2 = inlined_call_operand.<no memory space> [shape: s32[1], index: 2, kind: input, shape index: {}]   ;;  %s527_s3 = inlined_call_operand.<no memory space> [shape: s32[1], index: 3, kind: input, shape index: {}]   ;;  %s528_s4 = inlined_call_operand.hbm [shape: bf16[16,256], index: 4, kind: input, shape index: {}]   ;;  %s529_s5 = inlined_call_operand.hbm [shape: bf16[1,256,128], index: 5, kind: input, shape index: {}]   ;;  %s530_s6 = inlined_call_operand.hbm [shape: f32[16,128], index: 6, kind: output, shape index: {}]  }
   0x1   :  { %12 = sst [smem:[#allocation5]] %s525_s1 }
   0x2   :  { %14 = sst [smem:[#allocation7]] %s527_s3 }
   0x3   :  { %15 = vsyncpa [#allocation9], 0 }
   0x4   :  { %16 = vsyncpa [#allocation12], 0 }
   0x5   :  { %17 = vsyncpa [#allocation10], 0  ;;  %s307_s27 = sshll.u32 %s524_s0, 7  ;;  %s433_s7 = smov [#allocation8]  }
   0x6   :  { %s26_s30 = scalar_lea.hbm %s528_s4, %s307_s27  ;;  %s27_s8 = sshll.u32 %s433_s7, 4  ;;  %s28_s8 = int_to_ptr.vmem [resolvable:$true] %s27_s8 }
   0x7   :  { %s357_s9 = scalar_lea.hbm %s26_s30, 256  ;;  %s359_s3 = scalar_lea.hbm %s528_s4, 256 }
   0x8   :  { %p358_p0 = scmp.ne.s32.totalorder %s26_s30, %s357_s9  ;;  %p360_p1 = scmp.lt.u32.totalorder %s26_s30, %s528_s4 }
   0x9   :  { %p361_p2 = scmp.lt.u32.totalorder %s359_s3, %s357_s9  ;;  %p363_p4 = scmp.lt.u32.totalorder %s357_s9, %s26_s30 }
   0xb   :  { %p362_p3 = por %p361_p2, %p360_p1 }
   0xd   :  { %p364_p5 = por %p363_p4, %p362_p3 }
   0xf   :  { %p365_p6 = pnand %p364_p5, %p358_p0 }
  0x11   :  { %368 = shalt.err (!%p365_p6)
}
  0x12   :  { %s369_s0 = scalar_lea.vmem %s28_s8, 256  ;;  %p374_p8 = scmp.lt.s32.totalorder %s28_s8, %s28_s8 }
  0x13   :  { %p370_p7 = scmp.ne.s32.totalorder %s28_s8, %s369_s0  ;;  %p375_p9 = scmp.lt.s32.totalorder %s369_s0, %s369_s0 }
  0x15   :  { %p376_p10 = por %p375_p9, %p374_p8 }
  0x17   :  { %p377_p11 = pnand %p376_p10, %p370_p7 }
  0x19   :  { %380 = shalt.err (!%p377_p11)
}
  0x1a   :  { %s434_s13 = smov 128   ;;  %s435_s14 = smov 8  }
  0x1b   :  { %33 = dma.hbm_to_vmem [thread:$0]  %s26_s30, 256, %s28_s8, [#allocation9], %s434_s13, %s434_s13, %s435_s14  }
  0x1c   :  { %s436_s4 = smov [#allocation11]   ;;  %s381_s18 = scalar_lea.hbm %s529_s5, 2048 }
  0x1d   :  { %s39_s15 = sshll.u32 %s436_s4, 4  ;;  %p382_p12 = scmp.ne.s32.totalorder %s529_s5, %s381_s18  ;;  %s40_s15 = int_to_ptr.vmem [resolvable:$true] %s39_s15 }
  0x1e   :  { %p385_p13 = scmp.lt.u32.totalorder %s381_s18, %s529_s5 }
  0x20   :  { %p387_p0 = pnand %p385_p13, %p382_p12 }
  0x22   :  { %390 = shalt.err (!%p387_p0)
}
  0x23   :  { %s391_s23 = scalar_lea.vmem %s40_s15, 2048  ;;  %p396_p2 = scmp.lt.s32.totalorder %s40_s15, %s40_s15 }
  0x24   :  { %p392_p1 = scmp.ne.s32.totalorder %s40_s15, %s391_s23  ;;  %p397_p3 = scmp.lt.s32.totalorder %s391_s23, %s391_s23 }
  0x26   :  { %p398_p4 = por %p397_p3, %p396_p2 }
  0x28   :  { %p399_p5 = pnand %p398_p4, %p392_p1 }
  0x2a   :  { %402 = shalt.err (!%p399_p5)
}
  0x2b   :  { %s437_s24 = smov 64   ;;  %s438_s25 = smov 4  }
  0x2c   :  { %45 = dma.hbm_to_vmem [thread:$0]  %s529_s5, 2048, %s40_s15, [#allocation12], %s437_s24, %s437_s24, %s438_s25  }
  0x2d   :  { %427 = dma.done.wait [#allocation9], 256  }
  0x2e   :  { %428 = vsyncadd [#allocation9], 4294967040 }
  0x2f   :  { %429 = dma.done.wait [#allocation12], 2048  }
  0x30   :  { %430 = vsyncadd [#allocation12], 4294965248  ;;  %p286_p6 = scmp.ne.s32.totalorder %s526_s2, 1 }
  0x31   :  { %v439_v0 = vmov (!%p286_p6), 0.0  }
  0x32   :  { %60 = sbr.rel (%p286_p6) target bundleno = 57 (0x39), region = 21  ;;  %61 = vst [vmem:[#allocation2] sm:$0xff] (!%p286_p6), %v439_v0  ;;  %62 = vst [vmem:[#allocation2 + $0x8] sm:$0xff] (!%p286_p6), %v439_v0 }
  0x39 PF:  { %v338_v1 = vld [vmem:[#allocation11 + $0x40] sm:$0xff]   ;;  %v340_v3 = vld [vmem:[#allocation11 + $0x48] sm:$0xff]   ;;  %v342_v5 = vld [vmem:[#allocation11 + $0x50] sm:$0xff]   ;;  %s250_s2 = sld [smem:[#allocation7]] }
  0x3a   :  { %v339_v2 = vld [vmem:[#allocation11] sm:$0xff]   ;;  %308 = vmatprep.subr.bf16.mxu0 %v338_v1  ;;  %v341_v4 = vld [vmem:[#allocation11 + $0x8] sm:$0xff]   ;;  %v343_v6 = vld [vmem:[#allocation11 + $0x10] sm:$0xff]  }
  0x3b   :  { %309 = vmatpush3.bf16.msra.mxu0 %v339_v2  ;;  %v344_v7 = vld [vmem:[#allocation11 + $0x58] sm:$0xff]   ;;  %v346_v9 = vld [vmem:[#allocation11 + $0x60] sm:$0xff]   ;;  %v348_v11 = vld [vmem:[#allocation11 + $0x68] sm:$0xff]  }
  0x3c   :  { %310 = vmatprep.subr.bf16.mxu0 %v340_v3  ;;  %v345_v8 = vld [vmem:[#allocation11 + $0x18] sm:$0xff]   ;;  %v347_v10 = vld [vmem:[#allocation11 + $0x20] sm:$0xff]   ;;  %v349_v13 = vld [vmem:[#allocation11 + $0x28] sm:$0xff]  }
  0x3d   :  { %v356_v12 = vld [vmem:[#allocation8 + $0x4] ss:$8 sps:$4 sm:$0xff]   ;;  %v354_v18 = vld [vmem:[#allocation8] ss:$8 sps:$4 sm:$0xff]   ;;  %v63_v20 = vld [vmem:[#allocation2] sm:$0xff] }
  0x3e   :  { %237 = vmatprep.mubr.bf16.mxu0 %v356_v12  ;;  %v350_v14 = vld [vmem:[#allocation11 + $0x70] sm:$0xff]   ;;  %v352_v16 = vld [vmem:[#allocation11 + $0x78] sm:$0xff]   ;;  %v64_v24 = vld [vmem:[#allocation2 + $0x8] sm:$0xff] }
  0x3f   :  { %311 = vmatpush3.bf16.msra.mxu0 %v341_v4  ;;  %v351_v15 = vld [vmem:[#allocation11 + $0x30] sm:$0xff]   ;;  %v353_v17 = vld [vmem:[#allocation11 + $0x38] sm:$0xff]   ;;  %p305_p7 = scmp.ne.s32.totalorder %s250_s2, 1 }
  0x40   :  { %312 = vmatprep.subr.bf16.mxu0 %v342_v5 }
  0x43   :  { %313 = vmatpush3.bf16.msra.mxu0 %v343_v6 }
  0x44   :  { %314 = vmatprep.subr.bf16.mxu0 %v344_v7 }
  0x47   :  { %315 = vmatpush3.bf16.msra.mxu0 %v345_v8 }
  0x48   :  { %316 = vmatprep.subr.bf16.mxu0 %v346_v9 }
  0x4b   :  { %317 = vmatpush3.bf16.msra.mxu0 %v347_v10 }
  0x4c   :  { %318 = vmatprep.subr.bf16.mxu0 %v348_v11 }
  0x4f   :  { %319 = vmatpush3.bf16.msra.mxu0 %v349_v13 }
  0x50   :  { %320 = vmatprep.subr.bf16.mxu0 %v350_v14 }
  0x53   :  { %321 = vmatpush3.bf16.msra.mxu0 %v351_v15 }
  0x54   :  { %322 = vmatprep.subr.bf16.mxu0 %v352_v16 }
  0x57   :  { %323 = vmatpush3.bf16.msra.mxu0 %v353_v17 }
  0x5a   :  { %238 = vmatmul.mubr.bf16.vlgmr.msra.gmra.mrb[0].mxu0 %v354_v18 }
 0x12d   :  { %v324_v19 = vpop.f32.mrb[0].mxu0 }
 0x12e   :  { %v325_v21 = vpop.f32.mrb[1].mxu0 }
 0x12f   :  { %v326_v22 = vadd.f32 %v325_v21, %v324_v19  ;;  %v327_v23 = vpop.f32.mrb[2].mxu0  ;;  %254 = sbr.rel (%p305_p7) target bundleno = 318 (0x13e), region = 25 }
 0x130   :  { %v328_v25 = vpop.f32.mrb[3].mxu0 }
 0x131   :  { %v246_v26 = vadd.f32 %v326_v22, %v63_v20  ;;  %v329_v27 = vadd.f32 %v328_v25, %v327_v23 }
 0x133   :  { %248 = vst [vmem:[#allocation2] sm:$0xff] %v246_v26  ;;  %v247_v28 = vadd.f32 %v329_v27, %v64_v24 }
 0x135   :  { %249 = vst [vmem:[#allocation2 + $0x8] sm:$0xff] %v247_v28 }
 0x13a   :  { %v255_v29 = vld [vmem:[#allocation2] sm:$0xff] }
 0x13b   :  { %257 = vst [vmem:[#allocation13] sm:$0xff] %v255_v29 }
 0x13c   :  { %v256_v30 = vld [vmem:[#allocation2 + $0x8] sm:$0xff] }
 0x13d   :  { %258 = vst [vmem:[#allocation13 + $0x8] sm:$0xff] %v256_v30 }
 0x13e PF:  { %s261_s5 = sld [smem:[#allocation5]]  ;;  %s440_s30 = smov [#allocation13]  }
 0x13f   :  { %s267_s7 = sshll.u32 %s440_s30, 4  ;;  %s268_s7 = int_to_ptr.vmem [resolvable:$true] %s267_s7 }
 0x140   :  { %s403_s3 = scalar_lea.vmem %s268_s7, 256  ;;  %p408_p9 = scmp.lt.s32.totalorder %s268_s7, %s268_s7 }
 0x141   :  { %p404_p8 = scmp.ne.s32.totalorder %s268_s7, %s403_s3  ;;  %p409_p10 = scmp.lt.s32.totalorder %s403_s3, %s403_s3 }
 0x143   :  { %p410_p11 = por %p409_p10, %p408_p9 }
 0x144   :  { %s306_s8 = sshll.u32 %s261_s5, 7 }
 0x145   :  { %s266_s10 = scalar_lea.hbm %s530_s6, %s306_s8  ;;  %p411_p12 = pnand %p410_p11, %p404_p8 }
 0x147   :  { %414 = shalt.err (!%p411_p12)
}
 0x148   :  { %s415_s11 = scalar_lea.hbm %s266_s10, 256  ;;  %s417_s4 = scalar_lea.hbm %s530_s6, 256 }
 0x149   :  { %p416_p13 = scmp.ne.s32.totalorder %s266_s10, %s415_s11  ;;  %p418_p0 = scmp.lt.u32.totalorder %s266_s10, %s530_s6 }
 0x14a   :  { %p419_p1 = scmp.lt.u32.totalorder %s417_s4, %s415_s11  ;;  %p421_p3 = scmp.lt.u32.totalorder %s415_s11, %s266_s10 }
 0x14c   :  { %p420_p2 = por %p419_p1, %p418_p0 }
 0x14e   :  { %p422_p4 = por %p421_p3, %p420_p2 }
 0x150   :  { %p423_p5 = pnand %p422_p4, %p416_p13 }
 0x152   :  { %426 = shalt.err (!%p423_p5)
}
 0x153   :  { %273 = dma.vmem_to_hbm [thread:$0]  %s268_s7, 256, %s266_s10, [#allocation10], %s434_s13, %s434_s13, %s435_s14  }
 0x154   :  { %431 = dma.done.wait [#allocation10], 256  }
 0x155   :  { %432 = vsyncadd [#allocation10], 4294967040 }
 0x156   :  { %277 = vsyncpa [#allocation9], 1 }
 0x157   :  { %278 = vsyncpa [#allocation12], 1 }
 0x158   :  { %279 = vsyncpa [#allocation10], 1 }

</bundles_post_ra>
